<compile_context>
chip_gen: v5e
topology: v5e:2x2
jax: 0.10.0
libtpu: 0.0.40
codegen_flags: <defaults>
</compile_context>

<pallas_src>
import jax
import jax.numpy as jnp
from jax import lax
from jax.experimental import pallas as pl
from jax.experimental.pallas import tpu as pltpu


def _linear_1x1_kernel(x_ref, w_ref, b_ref, o_ref):
    # x_ref: (Bb, C_in, t_hw)   w_ref: (C_out, C_in)   b_ref: (C_out, 1)
    # o_ref: (Bb, C_out, t_hw)
    w = w_ref[...]
    b = b_ref[...]
    # Static unrolled loop over the batch slab: each slice is a plain 2-D MXU
    # matmul (no batched-dot transpose/relayout), weight stays resident.
    for bb in range(x_ref.shape[0]):
        acc = jnp.dot(
            w, x_ref[bb],
            preferred_element_type=jnp.float32,
            precision=lax.Precision.HIGHEST,   # fp32 parity; free (mem-bound)
        )
        o_ref[bb] = (acc + b).astype(o_ref.dtype)


def _vmem_capacity_bytes():
    """Physical VMEM of the attached TPU; conservative 64 MiB fallback (v7x)."""
    try:
        cap = int(pltpu.get_tpu_info().vmem_capacity_bytes)
        if cap >= (32 << 20):
            return cap
    except Exception:
        pass
    return 64 << 20


def _largest_128_divisor(n, cap):
    """Largest divisor of n that is a multiple of 128 and <= cap (0 if none)."""
    best = 0
    i = 1
    while i * i <= n:
        if n % i == 0:
            for d in (i, n // i):
                if d % 128 == 0 and d <= cap and d > best:
                    best = d
        i += 1
    return best


def _choose_tiling(B, C_in, C_out, HW, bpe, vmem_cap):
    """Pick (Bb, t_hw) from the channel count and a per-generation VMEM budget.

    Per grid step we move Bb*(C_in+C_out)*t_hw*bpe bytes; the tile is sized as
    large as the double-buffered VMEM budget allows so the ~0.35us per-step
    pipeline overhead is amortized.  Budget ~1/3 of physical VMEM (<=48 MiB),
    which keeps the wide 512-channel layers safe on v7x (64 MiB) while letting
    v5e/v6e (128 MiB) run much larger tiles.
    """
    tile_budget = min(vmem_cap // 3, 48 << 20)
    per_lane = 2 * (C_in + C_out) * bpe          # double-buffered bytes / lane
    lanes_budget = max(128, tile_budget // per_lane)

    if HW <= lanes_budget:
        # Whole HW fits in one tile: block several batch elements per step.
        t_hw = HW
        max_bb = max(1, lanes_budget // HW)
        bb = 1
        for d in range(1, B + 1):                # largest divisor of B <= max_bb
            if B % d == 0 and d <= max_bb:
                bb = d
        if bb == B and B > 1:
            # Keep >=2 grid steps so both v7x TensorCores stay busy.
            for d in range(B // 2, 0, -1):
                if B % d == 0:
                    bb = d
                    break
    else:
        bb = 1
        ragged = (lanes_budget // 128) * 128
        div = _largest_128_divisor(HW, lanes_budget)
        # Prefer an evenly-dividing 128-multiple tile (no masked tail stores),
        # falling back to a ragged last block only if no decent divisor exists.
        t_hw = div if div >= max(128, ragged // 2) else ragged

    num_hw = pl.cdiv(HW, t_hw)
    # Single-step grid (only possible when B == 1 here): split HW so a v7x
    # megacore grid has >=2 steps.  Harmless on single-core v5e/v6e.
    if (B // bb) * num_hw == 1 and HW >= 256:
        div = _largest_128_divisor(HW, HW // 2)
        t_hw = div if div >= 128 else max(128, ((HW // 2) // 128) * 128)
        num_hw = pl.cdiv(HW, t_hw)

    return bb, t_hw, num_hw


@jax.jit
def linear_1x1_conv(x_nchw, weight, bias):
    """1x1 Conv2d with bias (PyTorch Conv2d(c_in, c_out, kernel_size=1)).

    x_nchw : (B, C_in, H, W)
    weight : (C_out, C_in, 1, 1)
    bias   : (C_out,)
    returns: (B, C_out, H, W)
    """
    B, C_in, H, W = x_nchw.shape
    C_out = weight.shape[0]
    HW = H * W

    bpe = jnp.dtype(x_nchw.dtype).itemsize
    vmem_cap = _vmem_capacity_bytes()
    bb, t_hw, num_hw = _choose_tiling(B, C_in, C_out, HW, bpe, vmem_cap)

    # Free reshapes (contiguous dims only): no transpose, no pad, no HBM copy.
    x3 = x_nchw.reshape(B, C_in, HW)
    w_mat = weight.reshape(C_out, C_in)
    b_mat = bias.reshape(C_out, 1)

    # VMEM limit: computed double-buffered need + headroom, capped per
    # generation (<= 3/4 of physical, <= 96 MiB) so wide layers that are fine
    # on v5e/v6e (128 MiB) don't OOM on v7x (64 MiB).
    tile_bytes = 2 * bb * (C_in + C_out) * t_hw * bpe
    static_bytes = (C_out * C_in + C_out) * bpe
    need = tile_bytes + static_bytes
    cap = min((vmem_cap * 3) // 4, 96 << 20)
    vmem_limit = int(min(max(need + need // 2 + (2 << 20), 32 << 20), cap))

    # NOTE: even for GraphWaveNet's widest layers (skip=256 / end=512 channels)
    # the full (C_out, C_in) weight is <= 1 MiB and stays resident, so the
    # contraction is kept in a single block (no K grid axis / accumulator);
    # only t_hw shrinks via the VMEM budget above.
    # TODO(synk): optional bf16 activation/output storage would halve HBM
    # traffic (MXU accumulation stays f32); kept f32 to match Conv2d numerics.
    out = pl.pallas_call(
        _linear_1x1_kernel,
        out_shape=jax.ShapeDtypeStruct((B, C_out, HW), x_nchw.dtype),
        grid_spec=pltpu.PrefetchScalarGridSpec(
            num_scalar_prefetch=0,
            grid=(B // bb, num_hw),
            in_specs=[
                pl.BlockSpec((bb, C_in, t_hw), lambda b, j: (b, 0, j)),
                pl.BlockSpec((C_out, C_in), lambda b, j: (0, 0)),
                pl.BlockSpec((C_out, 1), lambda b, j: (0, 0)),
            ],
            out_specs=pl.BlockSpec((bb, C_out, t_hw), lambda b, j: (b, 0, j)),
        ),
        compiler_params=pltpu.CompilerParams(
            dimension_semantics=("parallel", "parallel"),
            vmem_limit_bytes=vmem_limit,
        ),
    )(x3, w_mat, b_mat)

    # (B, C_out, HW) -> NCHW, free reshape.
    return out.reshape(B, C_out, H, W)


if __name__ == "__main__":
    # Small shapes consistent with the module's forward.
    B, C_in, C_out, H, W = 2, 4, 8, 16, 16

    key = jax.random.PRNGKey(0)
    kx, kw, kb = jax.random.split(key, 3)

    x = jax.random.normal(kx, (B, C_in, H, W), dtype=jnp.float32)
    # Deterministic synthetic parameters (Conv2d(c_in, c_out, 1) shapes).
    weight = jax.random.normal(kw, (C_out, C_in, 1, 1), dtype=jnp.float32) * 0.1
    bias = jax.random.normal(kb, (C_out,), dtype=jnp.float32) * 0.1

    out = linear_1x1_conv(x, weight, bias)
    out = jax.block_until_ready(out)

    # Cross-check against a plain-JAX reference of the 1x1 conv.
    ref = (
        jnp.einsum(
            "bchw,oc->bohw", x, weight.reshape(C_out, C_in),
            precision=lax.Precision.HIGHEST,
        )
        + bias[None, :, None, None]
    )
    assert out.shape == (B, C_out, H, W)
    assert jnp.allclose(out, ref, atol=1e-5, rtol=1e-5)

    print("KERNEL_OK")
</pallas_src>

<mosaic_0001>
module attributes {stable_mosaic.version = 11 : i64} {
  func.func @_linear_1x1_kernel(%arg0: i32, %arg1: i32, %arg2: memref<1x4x256xf32, #tpu.memory_space<vmem>>, %arg3: memref<8x4xf32, #tpu.memory_space<vmem>>, %arg4: memref<8x1xf32, #tpu.memory_space<vmem>>, %arg5: memref<1x8x256xf32, #tpu.memory_space<vmem>>) attributes {dimension_semantics = [#tpu.dimension_semantics<parallel>, #tpu.dimension_semantics<parallel>], iteration_bounds = array<i64: 2, 1>, scalar_prefetch = 0 : i64, scratch_operands = 0 : i64, tpu.core_type = #tpu.core_type<tc>, window_params = [{transform_indices = @transform_0, window_bounds = array<i64: 1, 4, 256>}, {pipeline_mode = #tpu.pipeline_mode<synchronous>, transform_indices = @transform_1, window_bounds = array<i64: 8, 4>}, {pipeline_mode = #tpu.pipeline_mode<synchronous>, transform_indices = @transform_2, window_bounds = array<i64: 8, 1>}, {transform_indices = @transform_3, window_bounds = array<i64: 1, 8, 256>}]} {
    %c0 = arith.constant 0 : index
    %c0_0 = arith.constant 0 : index
    %0 = vector.load %arg3[%c0, %c0_0] : memref<8x4xf32, #tpu.memory_space<vmem>>, vector<8x4xf32>
    %c0_1 = arith.constant 0 : index
    %c0_2 = arith.constant 0 : index
    %1 = vector.load %arg4[%c0_1, %c0_2] : memref<8x1xf32, #tpu.memory_space<vmem>>, vector<8x1xf32>
    %c0_3 = arith.constant 0 : index
    %c0_4 = arith.constant 0 : index
    %c0_5 = arith.constant 0 : index
    %2 = vector.load %arg2[%c0_3, %c0_4, %c0_5] : memref<1x4x256xf32, #tpu.memory_space<vmem>>, vector<1x4x256xf32>
    %3 = vector.shape_cast %2 : vector<1x4x256xf32> to vector<4x256xf32>
    %cst = arith.constant dense<0.000000e+00> : vector<8x256xf32>
    %4 = tpu.matmul %0, %3, %cst {dimension_numbers = #tpu.dot_dimension_numbers<[1], [0], [0], [1], [0, 0, 1, 1], [], []>, precision = #tpu.contract_precision<fp32>} : vector<8x4xf32>, vector<4x256xf32>, vector<8x256xf32> -> vector<8x256xf32>
    %5 = vector.broadcast %1 : vector<8x1xf32> to vector<8x256xf32>
    %6 = arith.addf %4, %5 : vector<8x256xf32>
    %c0_6 = arith.constant 0 : index
    %c0_7 = arith.constant 0 : index
    %c0_8 = arith.constant 0 : index
    %7 = vector.load %arg5[%c0_6, %c0_7, %c0_8] : memref<1x8x256xf32, #tpu.memory_space<vmem>>, vector<1x8x256xf32>
    %8 = vector.shape_cast %7 : vector<1x8x256xf32> to vector<8x256xf32>
    %9 = vector.shape_cast %6 : vector<8x256xf32> to vector<1x8x256xf32>
    tpu.vector_store %arg5[%c0_6, %c0_7, %c0_8], %9 {strides = array<i32>} : memref<1x8x256xf32, #tpu.memory_space<vmem>>, vector<1x8x256xf32>,
    return
  }
  func.func @transform_0(%arg0: i32, %arg1: i32) -> (i32, i32, i32) {
    %c0_i32 = arith.constant 0 : i32
    %c0_i32_0 = arith.constant 0 : i32
    return %arg0, %c0_i32, %arg1 : i32, i32, i32
  }
  func.func @transform_1(%arg0: i32, %arg1: i32) -> (i32, i32) {
    %c0_i32 = arith.constant 0 : i32
    %c0_i32_0 = arith.constant 0 : i32
    %c0_i32_1 = arith.constant 0 : i32
    return %c0_i32, %c0_i32_0 : i32, i32
  }
  func.func @transform_2(%arg0: i32, %arg1: i32) -> (i32, i32) {
    %c0_i32 = arith.constant 0 : i32
    %c0_i32_0 = arith.constant 0 : i32
    %c0_i32_1 = arith.constant 0 : i32
    return %c0_i32, %c0_i32_0 : i32, i32
  }
  func.func @transform_3(%arg0: i32, %arg1: i32) -> (i32, i32, i32) {
    %c0_i32 = arith.constant 0 : i32
    %c0_i32_0 = arith.constant 0 : i32
    return %arg0, %c0_i32, %arg1 : i32, i32, i32
  }
}

</mosaic_0001>

<bundles_post_ra>
// kernel: linear_1x1_conv.1
= control target key start
LH: loop header
LB: loop body
LE: loop exit
PB: predicated region body
PF: predicated region fallthrough
CT: control target
= control target key end

     0   :  { %s696_s12 = smov 0   ;;  %s698_s13 = smov 0   ;;  %s739_s0 = inlined_call_operand.vmem [shape: f32[2,4,256], index: 0, kind: input, shape index: {}]   ;;  %s740_s1 = inlined_call_operand.vmem [shape: f32[8,4], index: 1, kind: input, shape index: {}]   ;;  %s741_s2 = inlined_call_operand.vmem [shape: f32[8,1], index: 2, kind: input, shape index: {}]   ;;  %s742_s3 = inlined_call_operand.vmem [shape: f32[2,8,256], index: 3, kind: output, shape index: {}]  }
   0x1   :  { %s700_s14 = smov 0  }
   0x2 LB: > { %s25_s15 = sadd.s32 1, %s669_s13  ;;  %p616_p0 = scmp.ge.s32.totalorder %s673_s14, 1  ;;  %s673_s14 = sphi %s700_s14, %s13_s14   ;;  %s669_s13 = sphi %s698_s13, %s744_s13   ;;  %s665_s12 = sphi %s696_s12, %s743_s12  }
   0x3   : > { %p27_p1 = scmp.ge.s32.totalorder %s25_s15, 2  ;;  %p158_p2 = scmp.lt.s32.totalorder %s673_s14, 3 }
   0x5   : > { %s746_s15 = smov (%p27_p1, %s25_s15), 0  ;;  %p159_p3 = pnand %p616_p0, %p158_p2 }
   0x6   : > { %p191_p4 = scmp.lt.s32.totalorder (!%p159_p3), %s665_s12, 1 }
   0x7   : > { %162 = sbr.rel (%p159_p3) target bundleno = 185 (0xb9), region = 32 }
   0xc   : > { %v210_v0 = vld [vmem:[%s740_s1] sm:$0xff]  ;;  %vm222_vm0 = vcmask 31744   ;;  %v675_v2 = vmov 0   ;;  %s748_s12 = smov (!%p191_p4, %s665_s12), 1  ;;  %vm226_vm1 = vcmask 1043456  }
   0xd   : > { %v224_v1 = vsel %vm222_vm0, %v210_v0, 0  ;;  %650 = vset.pattern.permute.xlu0 %v675_v2  ;;  %v211_v4 = vld [vmem:[%s741_s2] sm:$0xff]  ;;  %s623_s20 = sshll.u32 %s748_s12, 3  ;;  %s624_s24 = sshll.u32 %s748_s12, 4 }
   0xe   : > { %v248_v3 = vand.u32 4294901760, %v224_v1  ;;  %215 = vperm.xlu0 %650, %v211_v4   ;;  %s198_s23 = scalar_lea.vmem %s739_s0, %s623_s20  ;;  %s208_s27 = scalar_lea.vmem %s742_s3, %s624_s24 }
   0xf   : > { %v212_v6 = vld [vmem:[%s198_s23] sm:$0xff] }
  0x10   : > { %v249_v5 = vsub.f32 %v224_v1, %v248_v3  ;;  %219 = vst [vmem:[#allocation1] ss:$2 sm:$0xff] %v212_v6 }
  0x12   : > { %v250_v7 = vand.u32 4294901760, %v249_v5 }
  0x14   : > { %v251_v8 = vsub.f32 %v249_v5, %v250_v7 }
  0x16   : > { %v252_v13 = vand.u32 4294901760, %v251_v8 }
  0x17   : > { %v220_v9 = vld.sshfl [vmem:[#allocation1] sm:$0xff pattern:$0x75316420]  ;;  %v221_v10 = vld.sshfl [vmem:[#allocation1 + $0x8] sm:$0xff pattern:$0x75316420] }
  0x18   : > { %v227_v11 = vsel %vm226_vm1, %v220_v9, 0  ;;  %v229_v12 = vsel %vm226_vm1, %v221_v10, 0 }
  0x19   : > { %v246_v14 = vand.u32 4294901760, %v227_v11  ;;  %v392_v15 = vand.u32 4294901760, %v229_v12 }
  0x1b   : > { %v273_v16 = vsub.f32 %v227_v11, %v246_v14  ;;  %247 = vmatpush.msra.mxu0 %v246_v14  ;;  %323 = vmatpush.msra.mxu3 %v246_v14  ;;  %v419_v17 = vsub.f32 %v229_v12, %v392_v15 }
  0x1c   : > { %253 = vmatmul.f32.vlgmr.msra.gmra.mxu0 %v252_v13  ;;  %327 = vmatmul.f32.vlgmr.msra.gmra.mxu3 %v250_v7 }
  0x1d   : > { %300 = vmatpush.msra.mxu2 %v273_v16  ;;  %v274_v18 = vand.u32 4294901760, %v273_v16  ;;  %v420_v19 = vand.u32 4294901760, %v419_v17 }
  0x1e   : > { %303 = vmatmul.f32.vlgmr.msra.gmra.mxu2 %v249_v5 }
  0x1f   : > { %393 = vmatpush.msrb.mxu2 %v392_v15  ;;  %349 = vmatpush.msrb.mxu0 %v274_v18  ;;  %v421_v20 = vsub.f32 %v419_v17, %v420_v19  ;;  %v275_v21 = vsub.f32 %v273_v16, %v274_v18 }
  0x21   : > { %495 = vmatpush.msra.mxu2 %v420_v19  ;;  %446 = vmatpush.msra.mxu0 %v419_v17  ;;  %v422_v22 = vand.u32 4294901760, %v421_v20  ;;  %v276_v23 = vand.u32 4294901760, %v275_v21 }
  0x23   : > { %423 = vmatpush.msrb.mxu3 %v422_v22  ;;  %277 = vmatpush.msra.mxu1 %v276_v23 }
  0x24   : > { %279 = vmatmul.f32.vlgmr.msra.gmra.mxu1 %v248_v3  ;;  %351 = vmatmul.f32.vlgmr.msrb.gmra.mxu0 %v248_v3 }
  0x25   : > { %371 = vmatpush.msrb.mxu1 %v246_v14  ;;  %425 = vmatmul.f32.vlgmr.msrb.gmra.mxu3 %v248_v3 }
  0x26   : > { %399 = vmatmul.f32.vlgmr.msrb.gmra.mxu2 %v252_v13  ;;  %517 = vmatpush.msra.mxu3 %v392_v15 }
  0x27   : > { %469 = vmatpush.msra.mxu1 %v392_v15 }
  0x2c   : > { %373 = vmatmul.f32.vlgmr.msrb.gmra.mxu1 %v248_v3  ;;  %449 = vmatmul.f32.vlgmr.msra.gmra.mxu0 %v249_v5 }
  0x2d   : > { %519 = vmatmul.f32.vlgmr.msra.gmra.mxu3 %v248_v3 }
  0x2e   : > { %497 = vmatmul.f32.vlgmr.msra.gmra.mxu2 %v248_v3 }
  0x34   : > { %473 = vmatmul.f32.vlgmr.msra.gmra.mxu1 %v250_v7 }
  0x80   : > { %v216_v25 = vpop.permute.xlu0 %215 }
  0x99   : > { %v254_v24 = vpop.f32.mrf.mxu0 }
  0x9a   : > { %v255_v26 = vadd.f32 %v254_v24, %v216_v25 }
  0x9f   : > { %v328_v27 = vpop.f32.mrf.mxu3 }
  0xa1   : > { %v280_v28 = vpop.f32.mrf.mxu1  ;;  %v304_v29 = vpop.f32.mrf.mxu2 }
  0xa2   : > { %v281_v30 = vadd.f32 %v280_v28, %v255_v26  ;;  %v352_v31 = vpop.f32.mrf.mxu0 }
  0xa4   : > { %v305_v32 = vadd.f32 %v304_v29, %v281_v30 }
  0xa6   : > { %v329_v33 = vadd.f32 %v328_v27, %v305_v32 }
  0xa8   : > { %v353_v34 = vadd.f32 %v352_v31, %v329_v33  ;;  %v426_v35 = vpop.f32.mrf.mxu3 }
  0xa9   : > { %v374_v36 = vpop.f32.mrf.mxu1  ;;  %v400_v37 = vpop.f32.mrf.mxu2 }
  0xaa   : > { %v375_v38 = vadd.f32 %v374_v36, %v353_v34  ;;  %v401_v39 = vadd.f32 %v400_v37, %v216_v25  ;;  %v450_v40 = vpop.f32.mrf.mxu0 }
  0xac   : > { %523 = vst [vmem:[%s208_s27] sm:$0xff] %v375_v38  ;;  %v427_v41 = vadd.f32 %v426_v35, %v401_v39 }
  0xae   : > { %v451_v42 = vadd.f32 %v450_v40, %v427_v41 }
  0xb0   : > { %v520_v46 = vpop.f32.mrf.mxu3 }
  0xb1   : > { %v474_v43 = vpop.f32.mrf.mxu1  ;;  %v498_v44 = vpop.f32.mrf.mxu2 }
  0xb2   : > { %v475_v45 = vadd.f32 %v474_v43, %v451_v42 }
  0xb4   : > { %v499_v47 = vadd.f32 %v498_v44, %v475_v45 }
  0xb6   : > { %v521_v48 = vadd.f32 %v520_v46, %v499_v47 }
  0xb8   : > { %524 = vst [vmem:[%s208_s27 + $0x8] sm:$0xff] %v521_v48 }
  0xb9 PF: > { %s13_s14 = sadd.s32 1, %s673_s14   ;;  %s743_s12 = smov %s669_s13 }
  0xba   : > { %p10_p5 = scmp.ge.s32.totalorder %s13_s14, 4   ;;  %s744_s13 = smov %s746_s15 }
  0xbc   :  { %12 = sbr.rel (!%p10_p5) target bundleno = 2 (0x2), region = 62 }

</bundles_post_ra>
